<compile_context>
chip_gen: v7x
topology: tpu7x:2x2x1
jax: 0.10.0
libtpu: 0.0.40
codegen_flags: <defaults>
</compile_context>

<pallas_src>
import jax
import jax.numpy as jnp
from jax import lax
from jax.experimental import pallas as pl
from jax.experimental.pallas import tpu as pltpu


def _round_up(x: int, m: int) -> int:
    return (x + m - 1) // m * m


def _linear_relu_kernel(x_ref, w_ref, b_ref, o_ref, acc_ref):
    """One (i, j, k) grid step of y = relu(x @ W.T + b).

    x_ref  : (tm, tk)  activations (compute dtype)
    w_ref  : (tn, tk)  weight, torch (out_features, in_features) layout
    b_ref  : (1,  tn)  bias, f32
    o_ref  : (tm, tn)  output tile
    acc_ref: (tm, tn)  f32 accumulator (VMEM scratch, persists across k)
    """
    k = pl.program_id(2)

    @pl.when(k == 0)
    def _init():
        # Fold the bias into the accumulator init (no separate epilogue add).
        acc_ref[...] = jnp.broadcast_to(
            b_ref[...].astype(jnp.float32), acc_ref.shape)

    # Contract the K axis of both operands: (tm, tk) x (tn, tk) -> (tm, tn).
    # Keeping the torch (out, in) weight layout avoids a wrapper-side
    # weight.T (a full un-fused HBM read+write of the weight per call).
    acc_ref[...] += lax.dot_general(
        x_ref[...], w_ref[...],
        dimension_numbers=(((1,), (1,)), ((), ())),
        preferred_element_type=jnp.float32)

    @pl.when(k == pl.num_programs(2) - 1)
    def _finalize():
        o_ref[...] = jnp.maximum(acc_ref[...], 0.0).astype(o_ref.dtype)


def config_module_forward(x, weight, bias, *,
                          block_m: int = 256,
                          block_n: int = 256,
                          block_k: int = 256,
                          compute_dtype=None):
    """ConfigModule forward for config: [Linear(in, out), ReLU()].

    x:      (B, in_features)              float32
    weight: (out_features, in_features)   torch.nn.Linear layout (NOT transposed)
    bias:   (out_features,)
    compute_dtype: optional MXU input dtype (e.g. jnp.bfloat16 on v6e/v7x);
                   accumulation / bias / ReLU stay in f32.
    returns (B, out_features) in x.dtype
    """
    B, K = x.shape
    N, Kw = weight.shape
    assert Kw == K, "weight in_features must match x"
    out_dtype = x.dtype

    if compute_dtype is not None and compute_dtype != x.dtype:
        x = x.astype(compute_dtype)
        weight = weight.astype(compute_dtype)
    bias = bias.astype(jnp.float32)

    # Tile sizes: multiples of the (8, 128) vreg, capped by the padded problem.
    tm = min(block_m, _round_up(B, 8))
    tn = min(block_n, _round_up(N, 128))
    tk = min(block_k, _round_up(K, 128))

    Bp, Np, Kp = _round_up(B, tm), _round_up(N, tn), _round_up(K, tk)

    # Zero-pad to tile boundaries: lane-dense output (N -> mult of 128),
    # full-sublane batch (B -> mult of 8). Zero K-padding contributes nothing.
    if (Bp, Kp) != (B, K):
        x = jnp.pad(x, ((0, Bp - B), (0, Kp - K)))
    if (Np, Kp) != (N, K):
        weight = jnp.pad(weight, ((0, Np - N), (0, Kp - K)))
    if Np != N:
        bias = jnp.pad(bias, (0, Np - N))
    bias2d = bias.reshape(1, Np)

    grid = (Bp // tm, Np // tn, Kp // tk)

    in_itemsize = jnp.dtype(x.dtype).itemsize
    out_itemsize = jnp.dtype(out_dtype).itemsize
    # Double-buffered inputs/outputs + f32 accumulator, with headroom.
    vmem_need = (2 * (tm * tk + tn * tk) * in_itemsize   # x, w (2 buffers each)
                 + 2 * tn * 4                            # bias tile
                 + 2 * tm * tn * out_itemsize            # output (2 buffers)
                 + tm * tn * 4)                          # f32 accumulator
    vmem_limit = int(min(32 * 1024 * 1024, max(4 * 1024 * 1024, 4 * vmem_need)))

    out_padded = pl.pallas_call(
        _linear_relu_kernel,
        out_shape=jax.ShapeDtypeStruct((Bp, Np), out_dtype),
        grid_spec=pltpu.PrefetchScalarGridSpec(
            num_scalar_prefetch=0,
            grid=grid,
            in_specs=[
                pl.BlockSpec((tm, tk), lambda i, j, k: (i, k)),   # x
                pl.BlockSpec((tn, tk), lambda i, j, k: (j, k)),   # weight
                pl.BlockSpec((1, tn), lambda i, j, k: (0, j)),    # bias
            ],
            out_specs=pl.BlockSpec((tm, tn), lambda i, j, k: (i, j)),
            scratch_shapes=[pltpu.VMEM((tm, tn), jnp.float32)],
        ),
        compiler_params=pltpu.CompilerParams(
            dimension_semantics=("parallel", "parallel", "arbitrary"),
            vmem_limit_bytes=vmem_limit,
        ),
        cost_estimate=pl.CostEstimate(
            flops=2 * B * K * N,
            transcendentals=0,
            bytes_accessed=(B * K + N * K) * in_itemsize
                           + N * 4 + B * N * out_itemsize,
        ),
    )(x, weight, bias2d)

    return out_padded[:B, :N]


def _reference(x, weight, bias):
    return jnp.maximum(x @ weight.T + bias, 0.0)


if __name__ == "__main__":
    # Shapes implied by the ConfigModule docstring example:
    #   network(torch.rand(2, 128)) with Linear(128, 8) + ReLU
    B, IN, OUT = 2, 128, 8

    key = jax.random.PRNGKey(0)
    kx, kw, kb = jax.random.split(key, 3)

    # torch.nn.Linear default init: U(-1/sqrt(in), 1/sqrt(in))
    bound = 1.0 / jnp.sqrt(jnp.float32(IN))
    weight = jax.random.uniform(kw, (OUT, IN), jnp.float32, -bound, bound)
    bias = jax.random.uniform(kb, (OUT,), jnp.float32, -bound, bound)
    x = jax.random.uniform(kx, (B, IN), jnp.float32)

    y_ref = _reference(x, weight, bias)

    # Default f32 path (strict tolerance).
    y = jax.block_until_ready(config_module_forward(x, weight, bias))
    assert y.shape == (B, OUT)
    assert jnp.allclose(y, y_ref, atol=1e-5, rtol=1e-5), "f32 mismatch vs reference"

    # bf16 MXU path (the v6e/v7x-preferred config): bf16 inputs, f32 accumulate.
    y_bf16 = jax.block_until_ready(
        config_module_forward(x, weight, bias, compute_dtype=jnp.bfloat16))
    assert y_bf16.shape == (B, OUT)
    assert jnp.allclose(y_bf16, y_ref, atol=2e-2, rtol=2e-2), "bf16 mismatch vs reference"

    print("KERNEL_OK")
</pallas_src>

<mosaic_0001>
module attributes {stable_mosaic.version = 11 : i64} {
  func.func @_linear_relu_kernel(%arg0: i32, %arg1: i32, %arg2: i32, %arg3: memref<8x128xf32, #tpu.memory_space<vmem>>, %arg4: memref<128x128xf32, #tpu.memory_space<vmem>>, %arg5: memref<1x128xf32, #tpu.memory_space<vmem>>, %arg6: memref<8x128xf32, #tpu.memory_space<vmem>>, %arg7: memref<8x128xf32, #tpu.memory_space<vmem>>) attributes {dimension_semantics = [#tpu.dimension_semantics<parallel>, #tpu.dimension_semantics<parallel>, #tpu.dimension_semantics<arbitrary>], iteration_bounds = array<i64: 1, 1, 1>, scalar_prefetch = 0 : i64, scratch_operands = 1 : i64, tpu.core_type = #tpu.core_type<tc>, window_params = [{transform_indices = @transform_0, window_bounds = array<i64: 8, 128>}, {transform_indices = @transform_1, window_bounds = array<i64: 128, 128>}, {transform_indices = @transform_2, window_bounds = array<i64: 1, 128>}, {transform_indices = @transform_3, window_bounds = array<i64: 8, 128>}]} {
    %c0_i32 = arith.constant 0 : i32
    %0 = arith.cmpi eq, %arg2, %c0_i32 : i32
    %1 = arith.extui %0 : i1 to i32
    %c0_i32_0 = arith.constant 0 : i32
    %2 = arith.cmpi ne, %1, %c0_i32_0 : i32
    scf.if %2 {
      %c0_10 = arith.constant 0 : index
      %c0_11 = arith.constant 0 : index
      %12 = vector.load %arg5[%c0_10, %c0_11] : memref<1x128xf32, #tpu.memory_space<vmem>>, vector<1x128xf32>
      %13 = vector.shape_cast %12 : vector<1x128xf32> to vector<1x128xf32>
      %14 = vector.broadcast %13 : vector<1x128xf32> to vector<8x128xf32>
      %c0_12 = arith.constant 0 : index
      %c0_13 = arith.constant 0 : index
      %15 = vector.load %arg7[%c0_12, %c0_13] : memref<8x128xf32, #tpu.memory_space<vmem>>, vector<8x128xf32>
      tpu.vector_store %arg7[%c0_12, %c0_13], %14 {strides = array<i32>} : memref<8x128xf32, #tpu.memory_space<vmem>>, vector<8x128xf32>,
    } else {
    }
    %c0 = arith.constant 0 : index
    %c0_1 = arith.constant 0 : index
    %3 = vector.load %arg7[%c0, %c0_1] : memref<8x128xf32, #tpu.memory_space<vmem>>, vector<8x128xf32>
    %c0_2 = arith.constant 0 : index
    %c0_3 = arith.constant 0 : index
    %4 = vector.load %arg3[%c0_2, %c0_3] : memref<8x128xf32, #tpu.memory_space<vmem>>, vector<8x128xf32>
    %c0_4 = arith.constant 0 : index
    %c0_5 = arith.constant 0 : index
    %5 = vector.load %arg4[%c0_4, %c0_5] : memref<128x128xf32, #tpu.memory_space<vmem>>, vector<128x128xf32>
    %cst = arith.constant dense<0.000000e+00> : vector<8x128xf32>
    %6 = tpu.matmul %4, %5, %cst {dimension_numbers = #tpu.dot_dimension_numbers<[1], [1], [0], [0], [0, 0, 1, 0], [], []>} : vector<8x128xf32>, vector<128x128xf32>, vector<8x128xf32> -> vector<8x128xf32>
    %7 = arith.addf %3, %6 : vector<8x128xf32>
    %c0_6 = arith.constant 0 : index
    %c0_7 = arith.constant 0 : index
    %8 = vector.load %arg7[%c0_6, %c0_7] : memref<8x128xf32, #tpu.memory_space<vmem>>, vector<8x128xf32>
    tpu.vector_store %arg7[%c0_6, %c0_7], %7 {strides = array<i32>} : memref<8x128xf32, #tpu.memory_space<vmem>>, vector<8x128xf32>,
    %c0_i32_8 = arith.constant 0 : i32
    %9 = arith.cmpi eq, %arg2, %c0_i32_8 : i32
    %10 = arith.extui %9 : i1 to i32
    %c0_i32_9 = arith.constant 0 : i32
    %11 = arith.cmpi ne, %10, %c0_i32_9 : i32
    scf.if %11 {
      %c0_10 = arith.constant 0 : index
      %c0_11 = arith.constant 0 : index
      %12 = vector.load %arg7[%c0_10, %c0_11] : memref<8x128xf32, #tpu.memory_space<vmem>>, vector<8x128xf32>
      %cst_12 = arith.constant 0.000000e+00 : f32
      %13 = vector.broadcast %cst_12 : f32 to vector<8x128xf32>
      %14 = arith.maximumf %12, %13 : vector<8x128xf32>
      %c0_13 = arith.constant 0 : index
      %c0_14 = arith.constant 0 : index
      %15 = vector.load %arg6[%c0_13, %c0_14] : memref<8x128xf32, #tpu.memory_space<vmem>>, vector<8x128xf32>
      tpu.vector_store %arg6[%c0_13, %c0_14], %14 {strides = array<i32>} : memref<8x128xf32, #tpu.memory_space<vmem>>, vector<8x128xf32>,
    } else {
    }
    return
  }
  func.func @transform_0(%arg0: i32, %arg1: i32, %arg2: i32) -> (i32, i32) {
    %c0_i32 = arith.constant 0 : i32
    return %arg0, %arg2 : i32, i32
  }
  func.func @transform_1(%arg0: i32, %arg1: i32, %arg2: i32) -> (i32, i32) {
    %c0_i32 = arith.constant 0 : i32
    return %arg1, %arg2 : i32, i32
  }
  func.func @transform_2(%arg0: i32, %arg1: i32, %arg2: i32) -> (i32, i32) {
    %c0_i32 = arith.constant 0 : i32
    %c0_i32_0 = arith.constant 0 : i32
    return %c0_i32, %arg1 : i32, i32
  }
  func.func @transform_3(%arg0: i32, %arg1: i32, %arg2: i32) -> (i32, i32) {
    %c0_i32 = arith.constant 0 : i32
    return %arg0, %arg1 : i32, i32
  }
}

</mosaic_0001>

<bundles_post_ra>
// kernel: tpu_custom_call.1
= control target key start
LH: loop header
LB: loop body
LE: loop exit
PB: predicated region body
PF: predicated region fallthrough
CT: control target
= control target key end

     0   :  { %8 = vsyncpa [#allocation4], 0  ;;  %s396_s0 = inlined_call_operand.hbm [shape: f32[8,128], index: 0, kind: input, shape index: {}]   ;;  %s397_s1 = inlined_call_operand.hbm [shape: f32[128,128], index: 1, kind: input, shape index: {}]   ;;  %s398_s2 = inlined_call_operand.vmem [shape: f32[1,128], index: 2, kind: input, shape index: {}]   ;;  %s399_s3 = inlined_call_operand.hbm [shape: f32[8,128], index: 3, kind: output, shape index: {}]  }
   0x1   :  { %9 = vsyncpa [#allocation7], 0 }
   0x2   :  { %10 = vsyncpa [#allocation5], 0  ;;  %s322_s12 = smov [#allocation3]   ;;  %s323_s14 = smov [#allocation6]  }
   0x3   :  { %s17_s13 = sshll.u32 %s322_s12, 4  ;;  %s26_s15 = sshll.u32 %s323_s14, 4  ;;  %s18_s13 = int_to_ptr.vmem [resolvable:$true] %s17_s13  ;;  %s350_s15 = int_to_ptr.vmem [resolvable:$true] %s26_s15 }
   0x4   :  { %s250_s18 = scalar_lea.hbm %s396_s0, 128 }
   0x5   :  { %p251_p0 = scmp.ne.s32.totalorder %s396_s0, %s250_s18  ;;  %p254_p1 = scmp.lt.u32.totalorder %s250_s18, %s396_s0 }
   0x7   :  { %p256_p2 = pnand %p254_p1, %p251_p0 }
   0x9   :  { %259 = shalt.err (!%p256_p2)
}
   0xa   :  { %s260_s23 = scalar_lea.vmem %s18_s13, 128  ;;  %p265_p4 = scmp.lt.s32.totalorder %s18_s13, %s18_s13 }
   0xb   :  { %p261_p3 = scmp.ne.s32.totalorder %s18_s13, %s260_s23  ;;  %p266_p5 = scmp.lt.s32.totalorder %s260_s23, %s260_s23 }
   0xd   :  { %p267_p6 = por %p266_p5, %p265_p4 }
   0xf   :  { %p268_p7 = pnand %p267_p6, %p261_p3 }
  0x11   :  { %271 = shalt.err (!%p268_p7)
}
  0x12   :  { %20 = dma.hbm_to_vmem [thread:$0]  %s396_s0, 128, %s18_s13, [#allocation4]  }
  0x13   :  { %s272_s28 = scalar_lea.hbm %s397_s1, 2048 }
  0x14   :  { %p273_p8 = scmp.ne.s32.totalorder %s397_s1, %s272_s28  ;;  %p276_p9 = scmp.lt.u32.totalorder %s272_s28, %s397_s1 }
  0x16   :  { %p278_p10 = pnand %p276_p9, %p273_p8 }
  0x18   :  { %281 = shalt.err (!%p278_p10)
}
  0x19   :  { %s282_s6 = scalar_lea.vmem %s350_s15, 2048  ;;  %p287_p12 = scmp.lt.s32.totalorder %s350_s15, %s350_s15 }
  0x1a   :  { %p283_p11 = scmp.ne.s32.totalorder %s350_s15, %s282_s6  ;;  %p288_p13 = scmp.lt.s32.totalorder %s282_s6, %s282_s6 }
  0x1c   :  { %p289_p0 = por %p288_p13, %p287_p12 }
  0x1e   :  { %p290_p1 = pnand %p289_p0, %p283_p11 }
  0x20   :  { %293 = shalt.err (!%p290_p1)
}
  0x21   :  { %s324_s0 = smov 128   ;;  %s325_s7 = smov 8  }
  0x22   :  { %32 = dma.hbm_to_vmem [thread:$0]  %s397_s1, 2048, %s350_s15, [#allocation7], %s324_s0, %s324_s0, %s325_s7  }
  0x23   :  { %316 = dma.done.wait [#allocation4], 128  }
  0x24   :  { %317 = vsyncadd [#allocation4], 4294967168 }
  0x25   :  { %318 = dma.done.wait [#allocation7], 2048  }
  0x26   :  { %319 = vsyncadd [#allocation7], 4294965248  ;;  %v326_v0 = vmov 0.0|0.0   ;;  %vm327_vm0 = vmmov 0   ;;  %v328_v1 = vmov 0.0   ;;  %v55_v2 = vld [vmem:[#allocation6] sm:$0xff] }
  0x27   :  { %218 = vmatprep.subr.bf16.mxu0 %v326_v0  ;;  %215 = vmatprep.mubr.msk.f32.mxu0 %vm327_vm0, %v328_v1  ;;  %v56_v3 = vld [vmem:[#allocation6 + $0x8] sm:$0xff]  ;;  %v57_v5 = vld [vmem:[#allocation6 + $0x10] sm:$0xff]  ;;  %v58_v6 = vld [vmem:[#allocation6 + $0x18] sm:$0xff]  ;;  %s329_s11 = smov [#allocation8]  }
  0x28   :  { %v219_v4 = vpack.c.bf16 %v56_v3, %v55_v2  ;;  %v222_v7 = vpack.c.bf16 %v58_v6, %v57_v5  ;;  %v59_v8 = vld [vmem:[#allocation6 + $0x20] sm:$0xff]  ;;  %v60_v9 = vld [vmem:[#allocation6 + $0x28] sm:$0xff]  ;;  %v61_v11 = vld [vmem:[#allocation6 + $0x30] sm:$0xff]  ;;  %s155_s12 = sshll.u32 %s329_s11, 4  ;;  %s156_s12 = int_to_ptr.vmem [resolvable:$true] %s155_s12 }
  0x29   :  { %v225_v10 = vpack.c.bf16 %v60_v9, %v59_v8  ;;  %v62_v12 = vld [vmem:[#allocation6 + $0x38] sm:$0xff]  ;;  %v63_v14 = vld [vmem:[#allocation6 + $0x40] sm:$0xff]  ;;  %v64_v15 = vld [vmem:[#allocation6 + $0x48] sm:$0xff]  ;;  %s294_s13 = scalar_lea.vmem %s156_s12, 128  ;;  %p299_p3 = scmp.lt.s32.totalorder %s156_s12, %s156_s12 }
  0x2a   :  { %220 = vmatpush3.bf16.xpose.msra.mxu0 %v219_v4  ;;  %v228_v13 = vpack.c.bf16 %v62_v12, %v61_v11  ;;  %v231_v16 = vpack.c.bf16 %v64_v15, %v63_v14  ;;  %v65_v17 = vld [vmem:[#allocation6 + $0x50] sm:$0xff]  ;;  %v66_v18 = vld [vmem:[#allocation6 + $0x58] sm:$0xff]  ;;  %v67_v20 = vld [vmem:[#allocation6 + $0x60] sm:$0xff]  ;;  %p295_p2 = scmp.ne.s32.totalorder %s156_s12, %s294_s13  ;;  %p300_p4 = scmp.lt.s32.totalorder %s294_s13, %s294_s13 }
  0x2b   :  { %221 = vmatprep.subr.bf16.mxu0 %v326_v0  ;;  %v234_v19 = vpack.c.bf16 %v66_v18, %v65_v17  ;;  %v68_v21 = vld [vmem:[#allocation6 + $0x68] sm:$0xff]  ;;  %v69_v23 = vld [vmem:[#allocation6 + $0x70] sm:$0xff]  ;;  %v70_v24 = vld [vmem:[#allocation6 + $0x78] sm:$0xff] }
  0x2c   :  { %v237_v22 = vpack.c.bf16 %v68_v21, %v67_v20  ;;  %v240_v25 = vpack.c.bf16 %v70_v24, %v69_v23  ;;  %v54_v26 = vld [vmem:[#allocation3] sm:$0xff]  ;;  %p301_p5 = por %p300_p4, %p299_p3 }
  0x2d   :  { %v165_v27 = vld [vmem:[%s398_s2] ss:$0 sm:$0xff] }
  0x2e   :  { %p302_p6 = pnand %p301_p5, %p295_p2 }
  0x32   :  { %223 = vmatpush3.bf16.xpose.msra.mxu0 %v222_v7 }
  0x33   :  { %224 = vmatprep.subr.bf16.mxu0 %v326_v0 }
  0x3a   :  { %226 = vmatpush3.bf16.xpose.msra.mxu0 %v225_v10 }
  0x3b   :  { %227 = vmatprep.subr.bf16.mxu0 %v326_v0 }
  0x42   :  { %229 = vmatpush3.bf16.xpose.msra.mxu0 %v228_v13 }
  0x43   :  { %230 = vmatprep.subr.bf16.mxu0 %v326_v0 }
  0x4a   :  { %232 = vmatpush3.bf16.xpose.msra.mxu0 %v231_v16 }
  0x4b   :  { %233 = vmatprep.subr.bf16.mxu0 %v326_v0 }
  0x52   :  { %235 = vmatpush3.bf16.xpose.msra.mxu0 %v234_v19 }
  0x53   :  { %236 = vmatprep.subr.bf16.mxu0 %v326_v0 }
  0x5a   :  { %238 = vmatpush3.bf16.xpose.msra.mxu0 %v237_v22 }
  0x5b   :  { %239 = vmatprep.subr.bf16.mxu0 %v326_v0 }
  0x62   :  { %241 = vmatpush3.bf16.xpose.msra.mxu0 %v240_v25 }
  0x69   :  { %216 = vmatmul.mubr.f32.vlgmr.msra.gmra.mrb[0].mxu0 %v54_v26 }
 0x13c   :  { %v137_v28 = vpop.f32.mrb[0].mxu0 }
 0x13d   :  { %v141_v29 = vadd.f32 %v165_v27, %v137_v28  ;;  %v217_v30 = vpop.f32.mrb[1].mxu0 }
 0x13f   :  { %v147_v31 = vmax.f32 %v141_v29, 0.0 }
 0x141   :  { %148 = vst [vmem:[#allocation8] sm:$0xff] %v147_v31 }
 0x142   :  { %305 = shalt.err (!%p302_p6)
}
 0x143   :  { %s306_s16 = scalar_lea.hbm %s399_s3, 128 }
 0x144   :  { %p307_p7 = scmp.ne.s32.totalorder %s399_s3, %s306_s16  ;;  %p310_p8 = scmp.lt.u32.totalorder %s306_s16, %s399_s3 }
 0x146   :  { %p312_p9 = pnand %p310_p8, %p307_p7 }
 0x148   :  { %315 = shalt.err (!%p312_p9)
}
 0x149   :  { %158 = dma.vmem_to_hbm [thread:$0]  %s156_s12, 128, %s399_s3, [#allocation5]  }
 0x14a   :  { %320 = dma.done.wait [#allocation5], 128  }
 0x14b   :  { %321 = vsyncadd [#allocation5], 4294967168 }
 0x14c   :  { %162 = vsyncpa [#allocation4], 1 }
 0x14d   :  { %163 = vsyncpa [#allocation7], 1 }
 0x14e   :  { %164 = vsyncpa [#allocation5], 1 }

</bundles_post_ra>
